<compile_context>
chip_gen: v7x
topology: tpu7x:2x2x1
jax: 0.10.0
libtpu: 0.0.40
codegen_flags: <defaults>
</compile_context>

<pallas_src>
import jax
import jax.numpy as jnp
from jax import lax
from jax.experimental import pallas as pl
from jax.experimental.pallas import tpu as pltpu

SMOOTHING = 0.01
LANE = 128
SUBLANE = 8
CHUNK_ROWS = 256          # rows per fused-reduction strip inside a block


def _round_up(x, m):
    return ((x + m - 1) // m) * m


def _stream_dtype(dtype):
    """Dtype we stream through HBM (cast to f32 happens inside the kernel)."""
    dtype = jnp.dtype(dtype)
    if dtype == jnp.bool_:
        return jnp.dtype(jnp.int8)        # binary masks: 4x less HBM traffic than f32
    if jnp.issubdtype(dtype, jnp.floating):
        return dtype                      # f32 / bf16 / f16 stream natively
    return jnp.dtype(jnp.float32)         # generic ints: no range assumptions


def _row_mult(dtype):
    # Minimum row granularity for clean sublane packing: 8 (4B), 16 (2B), 32 (1B).
    return max(SUBLANE, 32 // jnp.dtype(dtype).itemsize)


def _make_dice_partial_kernel(tile_rows, chunk_rows, rows, needs_mask, n_blocks):
    """Per-block partials: part[0,:, :128] = sum(yt*yp), part[0,:, 128:] = sum(yt+yp)."""
    n_chunks = tile_rows // chunk_rows
    mask_all = needs_mask and n_blocks == 1     # single ragged block: mask unconditionally

    def accumulate(yt_ref, yp_ref, part_ref, masked):
        prod_acc = jnp.zeros((SUBLANE, LANE), jnp.float32)
        tot_acc = jnp.zeros((SUBLANE, LANE), jnp.float32)
        base = pl.program_id(0) * tile_rows
        # Static strip-mined loop (fully unrolled, static slices): fuses the
        # cast/mul/add into the reduction so live state stays at two (8,128)
        # accumulators plus one strip — never a full-block temporary.
        for c in range(n_chunks):
            yt = yt_ref[pl.ds(c * chunk_rows, chunk_rows), :].astype(jnp.float32)
            yp = yp_ref[pl.ds(c * chunk_rows, chunk_rows), :].astype(jnp.float32)
            prod = yt * yp      # intersection terms
            tot = yt + yp       # fused denominator terms
            if masked:
                # Zero contributions of rows past the logical end of the data:
                # the ragged last block's out-of-bounds reads are undefined.
                row = lax.broadcasted_iota(jnp.int32, (chunk_rows, LANE), 0)
                valid = (base + c * chunk_rows + row) < rows
                prod = jnp.where(valid, prod, 0.0)
                tot = jnp.where(valid, tot, 0.0)
            # (chunk, 128) -> (chunk//8, 8, 128) -> (8, 128): maps exactly onto
            # vreg boundaries, so the reduction is plain vreg-wise VALU adds.
            prod_acc = prod_acc + prod.reshape(-1, SUBLANE, LANE).sum(axis=0)
            tot_acc = tot_acc + tot.reshape(-1, SUBLANE, LANE).sum(axis=0)
        # Lane-aligned full-vreg stores into this block's partial slot.
        part_ref[0, :, :LANE] = prod_acc
        part_ref[0, :, LANE:] = tot_acc

    def kernel(yt_ref, yp_ref, part_ref):
        if (not needs_mask) or mask_all:
            accumulate(yt_ref, yp_ref, part_ref, masked=mask_all)
        else:
            last = pl.num_programs(0) - 1

            @pl.when(pl.program_id(0) != last)
            def _():                        # fast path: pure mul/add, no mask
                accumulate(yt_ref, yp_ref, part_ref, masked=False)

            @pl.when(pl.program_id(0) == last)
            def _():                        # ragged tail block only
                accumulate(yt_ref, yp_ref, part_ref, masked=True)

    return kernel


def dice(y_true, y_pred, *, tile_rows=4096):
    """Soft Dice: (2*sum(yt*yp)+eps) / (sum(yt)+sum(yp)+eps), global sums."""
    assert y_true.shape == y_pred.shape
    total = int(y_true.size)

    yt_dt = _stream_dtype(y_true.dtype)
    yp_dt = _stream_dtype(y_pred.dtype)
    row_mult = max(_row_mult(yt_dt), _row_mult(yp_dt))
    padded = _round_up(total, row_mult * LANE)

    def to_slab(x, dt):
        xf = jnp.ravel(x)
        if xf.dtype != dt:
            xf = xf.astype(dt)
        if padded != total:
            # Zero padding is sum-neutral; skipped entirely for aligned inputs.
            xf = jnp.pad(xf, (0, padded - total))
        return xf.reshape(-1, LANE)

    yt2 = to_slab(y_true, yt_dt)
    yp2 = to_slab(y_pred, yp_dt)
    rows = yt2.shape[0]                    # multiple of row_mult by construction

    # Tile sizing: big blocks (default 4096 rows) strip-mined in 256-row chunks;
    # tiny inputs run as a single exact-size block (no overhang, no mask).
    if rows >= CHUNK_ROWS:
        tr = min(_round_up(tile_rows, CHUNK_ROWS), _round_up(rows, CHUNK_ROWS))
        chunk = CHUNK_ROWS
    else:
        tr = rows
        chunk = rows
    n_blocks = pl.cdiv(rows, tr)
    needs_mask = (rows % tr) != 0

    kernel = _make_dice_partial_kernel(tr, chunk, rows, needs_mask, n_blocks)

    # Explicit VMEM budget: 2 inputs x double-buffer x block bytes, plus headroom
    # for the output blocks, in-kernel strip temporaries and compiler scratch.
    # Portable across the per-generation scoped-VMEM defaults (16/32/32 MiB).
    block_in_bytes = tr * LANE * (yt2.dtype.itemsize + yp2.dtype.itemsize)
    vmem_limit = int(2 * block_in_bytes + (16 << 20))

    parts = pl.pallas_call(
        kernel,
        out_shape=jax.ShapeDtypeStruct((n_blocks, SUBLANE, 2 * LANE), jnp.float32),
        grid_spec=pltpu.PrefetchScalarGridSpec(
            num_scalar_prefetch=0,
            grid=(n_blocks,),
            in_specs=[
                pl.BlockSpec((tr, LANE), lambda i: (i, 0)),
                pl.BlockSpec((tr, LANE), lambda i: (i, 0)),
            ],
            # Each step writes a distinct partial block -> no carried state,
            # safe to shard across TensorCores (v7x megacore).
            out_specs=pl.BlockSpec((1, SUBLANE, 2 * LANE), lambda i: (i, 0, 0)),
        ),
        compiler_params=pltpu.CompilerParams(
            dimension_semantics=("parallel",),
            vmem_limit_bytes=vmem_limit,
        ),
    )(yt2, yp2)

    # Single reduction pass over the partials, then split the two lane halves.
    sums = jnp.sum(parts.reshape(-1, 2, LANE), axis=(0, 2))
    inter, denom = sums[0], sums[1]
    return (2.0 * inter + SMOOTHING) / (denom + SMOOTHING)


def _reference(y_true, y_pred):
    """Pure-JAX mirror of the PyTorch module (global sums)."""
    bs = y_true.shape[0]
    yt_f = jnp.reshape(y_true, (bs, -1)).astype(jnp.float32)
    yp_f = jnp.reshape(y_pred, (bs, -1)).astype(jnp.float32)
    inter = jnp.sum(yt_f * yp_f)
    return (2.0 * inter + SMOOTHING) / (jnp.sum(yt_f) + jnp.sum(yp_f) + SMOOTHING)


if __name__ == "__main__":
    key = jax.random.PRNGKey(0)
    k1, k2, k3, k4 = jax.random.split(key, 4)

    # NCHW, same convention as the PyTorch module's inputs.
    y_true = (jax.random.uniform(k1, (2, 4, 16, 16)) > 0.5).astype(jnp.float32)
    y_pred = jax.random.uniform(k2, (2, 4, 16, 16), dtype=jnp.float32)

    result = dice(y_true, y_pred)
    jax.block_until_ready(result)
    ref = _reference(y_true, y_pred)
    assert jnp.allclose(result, ref, rtol=1e-5, atol=1e-6), (result, ref)

    # Extra check: non-lane-aligned size + bool mask streamed as int8.
    y_true2 = jax.random.uniform(k3, (2, 3, 7, 11)) > 0.5
    y_pred2 = jax.random.uniform(k4, (2, 3, 7, 11), dtype=jnp.float32)
    result2 = dice(y_true2, y_pred2)
    jax.block_until_ready(result2)
    ref2 = _reference(y_true2, y_pred2)
    assert jnp.allclose(result2, ref2, rtol=1e-5, atol=1e-6), (result2, ref2)

    print("KERNEL_OK")
</pallas_src>

<mosaic_0001>
module attributes {stable_mosaic.version = 11 : i64} {
  func.func @kernel(%arg0: i32, %arg1: memref<16x128xf32, #tpu.memory_space<vmem>>, %arg2: memref<16x128xf32, #tpu.memory_space<vmem>>, %arg3: memref<1x8x256xf32, #tpu.memory_space<vmem>>) attributes {dimension_semantics = [#tpu.dimension_semantics<parallel>], iteration_bounds = array<i64: 1>, scalar_prefetch = 0 : i64, scratch_operands = 0 : i64, tpu.core_type = #tpu.core_type<tc>, window_params = [{transform_indices = @transform_0, window_bounds = array<i64: 16, 128>}, {transform_indices = @transform_1, window_bounds = array<i64: 16, 128>}, {transform_indices = @transform_2, window_bounds = array<i64: 1, 8, 256>}]} {
    %cst = arith.constant 0.000000e+00 : f32
    %0 = vector.broadcast %cst : f32 to vector<8x128xf32>
    %cst_0 = arith.constant 0.000000e+00 : f32
    %1 = vector.broadcast %cst_0 : f32 to vector<8x128xf32>
    %c0 = arith.constant 0 : index
    %c0_1 = arith.constant 0 : index
    %2 = vector.load %arg1[%c0, %c0_1] : memref<16x128xf32, #tpu.memory_space<vmem>>, vector<16x128xf32>
    %c0_2 = arith.constant 0 : index
    %c0_3 = arith.constant 0 : index
    %3 = vector.load %arg2[%c0_2, %c0_3] : memref<16x128xf32, #tpu.memory_space<vmem>>, vector<16x128xf32>
    %4 = arith.mulf %2, %3 : vector<16x128xf32>
    %5 = arith.addf %2, %3 : vector<16x128xf32>
    %6 = vector.shape_cast %4 : vector<16x128xf32> to vector<2x8x128xf32>
    %cst_4 = arith.constant dense<0.000000e+00> : vector<8x128xf32>
    %7 = vector.multi_reduction <add>, %6, %cst_4 [0] : vector<2x8x128xf32> to vector<8x128xf32>
    %8 = arith.addf %0, %7 : vector<8x128xf32>
    %9 = vector.shape_cast %5 : vector<16x128xf32> to vector<2x8x128xf32>
    %cst_5 = arith.constant dense<0.000000e+00> : vector<8x128xf32>
    %10 = vector.multi_reduction <add>, %9, %cst_5 [0] : vector<2x8x128xf32> to vector<8x128xf32>
    %11 = arith.addf %1, %10 : vector<8x128xf32>
    %c0_6 = arith.constant 0 : index
    %c0_7 = arith.constant 0 : index
    %c0_8 = arith.constant 0 : index
    %12 = vector.load %arg3[%c0_6, %c0_7, %c0_8] : memref<1x8x256xf32, #tpu.memory_space<vmem>>, vector<1x8x128xf32>
    %13 = vector.shape_cast %12 : vector<1x8x128xf32> to vector<8x128xf32>
    %14 = vector.shape_cast %8 : vector<8x128xf32> to vector<1x8x128xf32>
    tpu.vector_store %arg3[%c0_6, %c0_7, %c0_8], %14 {strides = array<i32>} : memref<1x8x256xf32, #tpu.memory_space<vmem>>, vector<1x8x128xf32>,
    %c0_9 = arith.constant 0 : index
    %c0_10 = arith.constant 0 : index
    %c128 = arith.constant 128 : index
    %15 = vector.load %arg3[%c0_9, %c0_10, %c128] : memref<1x8x256xf32, #tpu.memory_space<vmem>>, vector<1x8x128xf32>
    %16 = vector.shape_cast %15 : vector<1x8x128xf32> to vector<8x128xf32>
    %17 = vector.shape_cast %11 : vector<8x128xf32> to vector<1x8x128xf32>
    tpu.vector_store %arg3[%c0_9, %c0_10, %c128], %17 {strides = array<i32>} : memref<1x8x256xf32, #tpu.memory_space<vmem>>, vector<1x8x128xf32>,
    return
  }
  func.func @transform_0(%arg0: i32) -> (i32, i32) {
    %c0_i32 = arith.constant 0 : i32
    %c0_i32_0 = arith.constant 0 : i32
    return %arg0, %c0_i32 : i32, i32
  }
  func.func @transform_1(%arg0: i32) -> (i32, i32) {
    %c0_i32 = arith.constant 0 : i32
    %c0_i32_0 = arith.constant 0 : i32
    return %arg0, %c0_i32 : i32, i32
  }
  func.func @transform_2(%arg0: i32) -> (i32, i32, i32) {
    %c0_i32 = arith.constant 0 : i32
    %c0_i32_0 = arith.constant 0 : i32
    %c0_i32_1 = arith.constant 0 : i32
    return %arg0, %c0_i32, %c0_i32_0 : i32, i32, i32
  }
}

</mosaic_0001>

<bundles_post_ra>
// kernel: tpu_custom_call.1
= control target key start
LH: loop header
LB: loop body
LE: loop exit
PB: predicated region body
PF: predicated region fallthrough
CT: control target
= control target key end

     0   :  { %7 = vsyncpa [#allocation3], 0  ;;  %s203_s0 = inlined_call_operand.hbm [shape: f32[16,128], index: 0, kind: input, shape index: {}]   ;;  %s204_s1 = inlined_call_operand.hbm [shape: f32[16,128], index: 1, kind: input, shape index: {}]   ;;  %s205_s2 = inlined_call_operand.hbm [shape: f32[1,8,256], index: 2, kind: output, shape index: {}]  }
   0x1   :  { %8 = vsyncpa [#allocation6], 0 }
   0x2   :  { %9 = vsyncpa [#allocation4], 0  ;;  %s147_s9 = smov [#allocation2]   ;;  %s75_s13 = scalar_lea.hbm %s203_s0, 256 }
   0x3   :  { %s15_s10 = sshll.u32 %s147_s9, 4  ;;  %p76_p0 = scmp.ne.s32.totalorder %s203_s0, %s75_s13  ;;  %s16_s10 = int_to_ptr.vmem [resolvable:$true] %s15_s10 }
   0x4   :  { %p79_p1 = scmp.lt.u32.totalorder %s75_s13, %s203_s0 }
   0x6   :  { %p81_p2 = pnand %p79_p1, %p76_p0 }
   0x8   :  { %84 = shalt.err (!%p81_p2)
}
   0x9   :  { %s85_s18 = scalar_lea.vmem %s16_s10, 256  ;;  %p90_p4 = scmp.lt.s32.totalorder %s16_s10, %s16_s10 }
   0xa   :  { %p86_p3 = scmp.ne.s32.totalorder %s16_s10, %s85_s18  ;;  %p91_p5 = scmp.lt.s32.totalorder %s85_s18, %s85_s18 }
   0xc   :  { %p92_p6 = por %p91_p5, %p90_p4 }
   0xe   :  { %p93_p7 = pnand %p92_p6, %p86_p3 }
  0x10   :  { %96 = shalt.err (!%p93_p7)
}
  0x11   :  { %s148_s19 = smov 128   ;;  %s149_s20 = smov 8  }
  0x12   :  { %21 = dma.hbm_to_vmem [thread:$0]  %s203_s0, 256, %s16_s10, [#allocation3], %s148_s19, %s148_s19, %s149_s20  }
  0x13   :  { %s150_s23 = smov [#allocation5]   ;;  %s97_s27 = scalar_lea.hbm %s204_s1, 256 }
  0x14   :  { %s27_s24 = sshll.u32 %s150_s23, 4  ;;  %p98_p8 = scmp.ne.s32.totalorder %s204_s1, %s97_s27  ;;  %s28_s24 = int_to_ptr.vmem [resolvable:$true] %s27_s24 }
  0x15   :  { %p101_p9 = scmp.lt.u32.totalorder %s97_s27, %s204_s1 }
  0x17   :  { %p103_p10 = pnand %p101_p9, %p98_p8 }
  0x19   :  { %106 = shalt.err (!%p103_p10)
}
  0x1a   :  { %s107_s4 = scalar_lea.vmem %s28_s24, 256  ;;  %p112_p12 = scmp.lt.s32.totalorder %s28_s24, %s28_s24 }
  0x1b   :  { %p108_p11 = scmp.ne.s32.totalorder %s28_s24, %s107_s4  ;;  %p113_p13 = scmp.lt.s32.totalorder %s107_s4, %s107_s4 }
  0x1d   :  { %p114_p0 = por %p113_p13, %p112_p12 }
  0x1f   :  { %p115_p1 = pnand %p114_p0, %p108_p11 }
  0x21   :  { %118 = shalt.err (!%p115_p1)
}
  0x22   :  { %33 = dma.hbm_to_vmem [thread:$0]  %s204_s1, 256, %s28_s24, [#allocation6], %s148_s19, %s148_s19, %s149_s20  }
  0x23   :  { %141 = dma.done.wait [#allocation3], 256  }
  0x24   :  { %142 = vsyncadd [#allocation3], 4294967040 }
  0x25   :  { %143 = dma.done.wait [#allocation6], 256  }
  0x26   :  { %144 = vsyncadd [#allocation6], 4294967040  ;;  %v40_v0 = vld [vmem:[#allocation2] sm:$0xff]  ;;  %v41_v1 = vld [vmem:[#allocation2 + $0x8] sm:$0xff]  ;;  %s151_s6 = smov [#allocation7]  }
  0x27   :  { %v42_v2 = vld [vmem:[#allocation5] sm:$0xff]  ;;  %v43_v3 = vld [vmem:[#allocation5 + $0x8] sm:$0xff]  ;;  %s60_s7 = sshll.u32 %s151_s6, 4  ;;  %s61_s7 = int_to_ptr.vmem [resolvable:$true] %s60_s7 }
  0x28   :  { %v44_v4 = vmul.f32 %v42_v2, %v40_v0  ;;  %v46_v5 = vadd.f32 %v42_v2, %v40_v0  ;;  %v45_v6 = vmul.f32 %v43_v3, %v41_v1  ;;  %v47_v7 = vadd.f32 %v43_v3, %v41_v1  ;;  %s119_s1 = scalar_lea.vmem %s61_s7, 256  ;;  %p124_p3 = scmp.lt.s32.totalorder %s61_s7, %s61_s7 }
  0x29   :  { %p120_p2 = scmp.ne.s32.totalorder %s61_s7, %s119_s1  ;;  %p125_p4 = scmp.lt.s32.totalorder %s119_s1, %s119_s1 }
  0x2a   :  { %v48_v8 = vadd.f32 %v45_v6, %v44_v4  ;;  %v50_v9 = vadd.f32 %v47_v7, %v46_v5 }
  0x2b   :  { %p126_p5 = por %p125_p4, %p124_p3 }
  0x2c   :  { %52 = vst [vmem:[#allocation7] sm:$0xff] %v48_v8  ;;  %53 = vst [vmem:[#allocation7 + $0x8] sm:$0xff] %v50_v9 }
  0x2d   :  { %p127_p6 = pnand %p126_p5, %p120_p2 }
  0x2f   :  { %130 = shalt.err (!%p127_p6)
}
  0x30   :  { %s131_s10 = scalar_lea.hbm %s205_s2, 256 }
  0x31   :  { %p132_p7 = scmp.ne.s32.totalorder %s205_s2, %s131_s10  ;;  %p135_p8 = scmp.lt.u32.totalorder %s131_s10, %s205_s2 }
  0x33   :  { %p137_p9 = pnand %p135_p8, %p132_p7 }
  0x35   :  { %140 = shalt.err (!%p137_p9)
}
  0x36   :  { %63 = dma.vmem_to_hbm [thread:$0]  %s61_s7, 256, %s205_s2, [#allocation4]  }
  0x37   :  { %145 = dma.done.wait [#allocation4], 256  }
  0x38   :  { %146 = vsyncadd [#allocation4], 4294967040 }
  0x39   :  { %67 = vsyncpa [#allocation3], 1 }
  0x3a   :  { %68 = vsyncpa [#allocation6], 1 }
  0x3b   :  { %69 = vsyncpa [#allocation4], 1 }

</bundles_post_ra>
